<compile_context>
chip_gen: v7x
topology: tpu7x:2x2x1
jax: 0.10.0
libtpu: 0.0.40
codegen_flags: <defaults>
</compile_context>

<pallas_src>
import jax
import jax.numpy as jnp
from jax.experimental import pallas as pl
from jax.experimental.pallas import tpu as pltpu  # noqa: F401  (kept for TPU backend import)


def _identity_kernel(x_ref, o_ref):
    # Output is aliased to the input (input_output_aliases={0: 0}), so the
    # result buffer already holds x.  Nothing to load, compute, or store.
    del x_ref, o_ref


@jax.jit
def identity_forward(x):
    """Pallas implementation of Identity.forward: returns x unchanged."""
    if x.size == 0:
        # Degenerate case: nothing to alias.
        return x
    return pl.pallas_call(
        _identity_kernel,
        out_shape=jax.ShapeDtypeStruct(x.shape, x.dtype),
        in_specs=[pl.BlockSpec(memory_space=pl.ANY)],
        out_specs=pl.BlockSpec(memory_space=pl.ANY),
        input_output_aliases={0: 0},
    )(x)


if __name__ == "__main__":
    key = jax.random.PRNGKey(0)

    # Shapes consistent with how the module is used (a 4-D feature map);
    # the constructor's `dim` argument is unused by the PyTorch module.
    B, C, H, W = 2, 4, 16, 16
    x = jax.random.normal(key, (B, C, H, W), jnp.float32)

    out = identity_forward(x)
    out = jax.block_until_ready(out)

    assert out.shape == x.shape, (out.shape, x.shape)
    assert out.dtype == x.dtype, (out.dtype, x.dtype)
    max_err = float(jnp.max(jnp.abs(out - x)))
    if max_err != 0.0:
        raise AssertionError(f"Identity mismatch: max abs err {max_err}")

    # Also exercise a non-float dtype and an odd shape to confirm the no-op
    # path is shape/dtype independent.
    y = jnp.arange(2 * 3 * 5, dtype=jnp.int32).reshape(2, 3, 5)
    out_y = jax.block_until_ready(identity_forward(y))
    assert out_y.shape == y.shape and out_y.dtype == y.dtype
    assert bool(jnp.all(out_y == y))

    print("KERNEL_OK")
</pallas_src>

<mosaic_0001>
module attributes {stable_mosaic.version = 11 : i64} {
  func.func @_identity_kernel(%arg0: memref<2x4x16x16xf32, #tpu.memory_space<any>>, %arg1: memref<2x4x16x16xf32, #tpu.memory_space<any>>) attributes {dimension_semantics = [], scalar_prefetch = 0 : i64, scratch_operands = 0 : i64, tpu.core_type = #tpu.core_type<tc>} {
    return
  }
}

</mosaic_0001>

<bundles_post_ra>
// kernel: identity_forward.1
= control target key start
LH: loop header
LB: loop body
LE: loop exit
PB: predicated region body
PF: predicated region fallthrough
CT: control target
= control target key end

     0   :  { %s16_s0 = inlined_call_operand.hbm [shape: f32[2,4,16,16], index: 0, kind: input, shape index: {}, may-alias: {0,1}]   ;;  %s17_s1 = inlined_call_operand.hbm [shape: f32[2,4,16,16], index: 1, kind: output, shape index: {}, may-alias: {0,1}]  }

</bundles_post_ra>
